<compile_context>
chip_gen: v7x
topology: tpu7x:2x2x1
jax: 0.10.0
libtpu: 0.0.40
codegen_flags: <defaults>
</compile_context>

<pallas_src>
import jax
import jax.numpy as jnp
from jax.experimental import pallas as pl
from jax.experimental.pallas import tpu as pltpu


def rope_kernel(q_ref, c_ref, s_ref, o_ref):
    # q_ref : (1, tT, H, D)   input dtype (f32 or bf16)
    # c_ref : (1, tT, 1, D)   f32, [cos, cos]
    # s_ref : (1, tT, 1, D)   f32, [sin, -sin]
    v = q_ref[...]
    d = v.shape[-1] // 2
    # Swap halves along the lane axis: rot[..., :d] = v[..., d:],
    #                                  rot[..., d:] = v[..., :d]
    rot = pltpu.roll(v, shift=d, axis=3)
    # bf16 * f32 promotes to f32; accumulate in f32, cast back on store.
    o_ref[...] = (v * c_ref[...] + rot * s_ref[...]).astype(o_ref.dtype)


class RoPE:
    """JAX/Pallas port of the PyTorch RoPE module."""

    def __init__(self, head_size, base=10000):
        assert head_size % 2 == 0
        self.head_size = head_size
        j = jnp.arange(0, head_size // 2, dtype=jnp.float32)
        self.thetas = jnp.power(float(base), -2.0 * j / head_size)
        self.context_length_cached = None
        # PyTorch-compatible bf16 caches, shape (1, T, 1, D//2).
        self.cos_cached = None
        self.sin_cached = None
        # Full-width signed f32 caches used by the kernel, shape (1, T, 1, D).
        self._C = None
        self._S = None

    def forward(self, q):
        # Mirrors the PyTorch forward(): (re)build caches for q's seq length.
        self._maybe_build_cache(q.shape[1])

    __call__ = forward

    def _maybe_build_cache(self, T):
        if self.context_length_cached == T:
            return
        self.context_length_cached = T
        D = self.head_size
        d = D // 2
        idx = jnp.arange(T, dtype=jnp.float32)
        freqs = jnp.outer(idx, self.thetas)                      # (T, d) f32
        cos_bf16 = jnp.cos(freqs).astype(jnp.bfloat16)
        sin_bf16 = jnp.sin(freqs).astype(jnp.bfloat16)
        self.cos_cached = cos_bf16.reshape(1, T, 1, d)
        self.sin_cached = sin_bf16.reshape(1, T, 1, d)
        # Exact bf16 -> f32 up-cast once (preserves PyTorch numerics, removes
        # per-tile converts in the kernel). Pre-shaped so the kernel only does
        # a broadcast multiply.
        cos = cos_bf16.astype(jnp.float32)
        sin = sin_bf16.astype(jnp.float32)
        self._C = jnp.concatenate([cos, cos], axis=-1).reshape(1, T, 1, D)
        self._S = jnp.concatenate([sin, -sin], axis=-1).reshape(1, T, 1, D)

    def rotate_embedding(self, q, *, t_tile_bytes=2 << 20):
        B, T, H, D = q.shape
        assert D == self.head_size
        self._maybe_build_cache(T)

        # Sequence tile sized so one q block is ~t_tile_bytes (works for both
        # f32 and bf16 q; 2 bufs in + 2 bufs out stays well under scoped VMEM
        # on v5e/v6e/v7x).
        itemsize = jnp.dtype(q.dtype).itemsize
        row_bytes = max(H * D * itemsize, 1)
        tT = max(1, min(T, t_tile_bytes // row_bytes))
        if T >= 8:
            tT = max(8, (tT // 8) * 8)
        tT = min(tT, T)
        n_t = pl.cdiv(T, tT)

        cost = pl.CostEstimate(
            flops=4 * B * T * H * D,
            transcendentals=0,
            bytes_accessed=2 * B * T * H * D * itemsize + 2 * T * D * 4,
        )

        return pl.pallas_call(
            rope_kernel,
            out_shape=jax.ShapeDtypeStruct((B, T, H, D), q.dtype),
            grid_spec=pltpu.PrefetchScalarGridSpec(
                num_scalar_prefetch=0,
                grid=(B, n_t),
                in_specs=[
                    pl.BlockSpec((1, tT, H, D), lambda b, t: (b, t, 0, 0)),
                    pl.BlockSpec((1, tT, 1, D), lambda b, t: (0, t, 0, 0)),
                    pl.BlockSpec((1, tT, 1, D), lambda b, t: (0, t, 0, 0)),
                ],
                out_specs=pl.BlockSpec((1, tT, H, D), lambda b, t: (b, t, 0, 0)),
            ),
            compiler_params=pltpu.CompilerParams(
                dimension_semantics=("parallel", "parallel"),
            ),
            cost_estimate=cost,
        )(q, self._C, self._S)


def _reference_rotate(q, cos_bf16, sin_bf16):
    # Pure-JAX reference matching the PyTorch semantics exactly.
    d = q.shape[-1] // 2
    cos = cos_bf16.astype(jnp.float32)   # (1, T, 1, d)
    sin = sin_bf16.astype(jnp.float32)
    v1, v2 = q[..., :d], q[..., d:]
    d1 = v1 * cos + v2 * sin
    d2 = v1 * (-sin) + v2 * cos
    return jnp.concatenate([d1, d2], axis=-1).astype(q.dtype)


if __name__ == "__main__":
    B, T, H, head_size = 2, 8, 4, 32

    key = jax.random.PRNGKey(0)
    q = jax.random.normal(key, (B, T, H, head_size), dtype=jnp.float32)

    rope = RoPE(head_size)
    rope(q)                               # forward(): builds the caches
    out = rope.rotate_embedding(q)
    out = jax.block_until_ready(out)

    ref = _reference_rotate(q, rope.cos_cached, rope.sin_cached)
    assert out.shape == q.shape and out.dtype == q.dtype
    assert jnp.allclose(out, ref, atol=1e-5, rtol=1e-5)

    print("KERNEL_OK")
</pallas_src>

<mosaic_0001>
module attributes {stable_mosaic.version = 11 : i64} {
  func.func @rope_kernel(%arg0: i32, %arg1: i32, %arg2: memref<1x8x4x32xf32, #tpu.memory_space<vmem>>, %arg3: memref<1x8x1x32xf32, #tpu.memory_space<vmem>>, %arg4: memref<1x8x1x32xf32, #tpu.memory_space<vmem>>, %arg5: memref<1x8x4x32xf32, #tpu.memory_space<vmem>>) attributes {dimension_semantics = [#tpu.dimension_semantics<parallel>, #tpu.dimension_semantics<parallel>], iteration_bounds = array<i64: 2, 1>, scalar_prefetch = 0 : i64, scratch_operands = 0 : i64, tpu.core_type = #tpu.core_type<tc>, window_params = [{transform_indices = @transform_0, window_bounds = array<i64: 1, 8, 4, 32>}, {transform_indices = @transform_1, window_bounds = array<i64: 1, 8, 1, 32>}, {transform_indices = @transform_2, window_bounds = array<i64: 1, 8, 1, 32>}, {transform_indices = @transform_3, window_bounds = array<i64: 1, 8, 4, 32>}]} {
    %c0 = arith.constant 0 : index
    %c0_0 = arith.constant 0 : index
    %c0_1 = arith.constant 0 : index
    %c0_2 = arith.constant 0 : index
    %0 = vector.load %arg2[%c0, %c0_0, %c0_1, %c0_2] : memref<1x8x4x32xf32, #tpu.memory_space<vmem>>, vector<1x8x4x32xf32>
    %c16_i32 = arith.constant 16 : i32
    %1 = tpu.dynamic_rotate %0 by %c16_i32 dim 3 : vector<1x8x4x32xf32>, i32 -> vector<1x8x4x32xf32>
    %c0_3 = arith.constant 0 : index
    %c0_4 = arith.constant 0 : index
    %c0_5 = arith.constant 0 : index
    %c0_6 = arith.constant 0 : index
    %2 = vector.load %arg3[%c0_3, %c0_4, %c0_5, %c0_6] : memref<1x8x1x32xf32, #tpu.memory_space<vmem>>, vector<1x8x1x32xf32>
    %3 = vector.broadcast %2 : vector<1x8x1x32xf32> to vector<1x8x4x32xf32>
    %4 = arith.mulf %0, %3 : vector<1x8x4x32xf32>
    %c0_7 = arith.constant 0 : index
    %c0_8 = arith.constant 0 : index
    %c0_9 = arith.constant 0 : index
    %c0_10 = arith.constant 0 : index
    %5 = vector.load %arg4[%c0_7, %c0_8, %c0_9, %c0_10] : memref<1x8x1x32xf32, #tpu.memory_space<vmem>>, vector<1x8x1x32xf32>
    %6 = vector.broadcast %5 : vector<1x8x1x32xf32> to vector<1x8x4x32xf32>
    %7 = arith.mulf %1, %6 : vector<1x8x4x32xf32>
    %8 = arith.addf %4, %7 : vector<1x8x4x32xf32>
    %c0_11 = arith.constant 0 : index
    %c0_12 = arith.constant 0 : index
    %c0_13 = arith.constant 0 : index
    %c0_14 = arith.constant 0 : index
    %9 = vector.load %arg5[%c0_11, %c0_12, %c0_13, %c0_14] : memref<1x8x4x32xf32, #tpu.memory_space<vmem>>, vector<1x8x4x32xf32>
    tpu.vector_store %arg5[%c0_11, %c0_12, %c0_13, %c0_14], %8 {strides = array<i32>} : memref<1x8x4x32xf32, #tpu.memory_space<vmem>>, vector<1x8x4x32xf32>,
    return
  }
  func.func @transform_0(%arg0: i32, %arg1: i32) -> (i32, i32, i32, i32) {
    %c0_i32 = arith.constant 0 : i32
    %c0_i32_0 = arith.constant 0 : i32
    %c0_i32_1 = arith.constant 0 : i32
    return %arg0, %arg1, %c0_i32, %c0_i32_0 : i32, i32, i32, i32
  }
  func.func @transform_1(%arg0: i32, %arg1: i32) -> (i32, i32, i32, i32) {
    %c0_i32 = arith.constant 0 : i32
    %c0_i32_0 = arith.constant 0 : i32
    %c0_i32_1 = arith.constant 0 : i32
    %c0_i32_2 = arith.constant 0 : i32
    return %c0_i32, %arg1, %c0_i32_0, %c0_i32_1 : i32, i32, i32, i32
  }
  func.func @transform_2(%arg0: i32, %arg1: i32) -> (i32, i32, i32, i32) {
    %c0_i32 = arith.constant 0 : i32
    %c0_i32_0 = arith.constant 0 : i32
    %c0_i32_1 = arith.constant 0 : i32
    %c0_i32_2 = arith.constant 0 : i32
    return %c0_i32, %arg1, %c0_i32_0, %c0_i32_1 : i32, i32, i32, i32
  }
  func.func @transform_3(%arg0: i32, %arg1: i32) -> (i32, i32, i32, i32) {
    %c0_i32 = arith.constant 0 : i32
    %c0_i32_0 = arith.constant 0 : i32
    %c0_i32_1 = arith.constant 0 : i32
    return %arg0, %arg1, %c0_i32, %c0_i32_0 : i32, i32, i32, i32
  }
}

</mosaic_0001>

<bundles_post_ra>
// kernel: tpu_custom_call.1
= control target key start
LH: loop header
LB: loop body
LE: loop exit
PB: predicated region body
PF: predicated region fallthrough
CT: control target
= control target key end

     0   :  { %8 = vsyncpa [#allocation3], 0  ;;  %s1334_s0 = inlined_call_operand.hbm [shape: f32[2,8,4,32], index: 0, kind: input, shape index: {}]   ;;  %s1335_s1 = inlined_call_operand.hbm [shape: f32[1,8,1,32], index: 1, kind: input, shape index: {}]   ;;  %s1336_s2 = inlined_call_operand.hbm [shape: f32[1,8,1,32], index: 2, kind: input, shape index: {}]   ;;  %s1337_s3 = inlined_call_operand.hbm [shape: f32[2,8,4,32], index: 3, kind: output, shape index: {}]  }
   0x1   :  { %10 = vsyncpa [#allocation3 + $0x1], 0 }
   0x2   :  { %11 = vsyncpa [#allocation6], 0 }
   0x3   :  { %12 = vsyncpa [#allocation4], 0 }
   0x4   :  { %14 = vsyncpa [#allocation4 + $0x1], 0  ;;  %s968_s12 = smov 0   ;;  %s970_s13 = smov 0  }
   0x5   :  { %s972_s14 = smov 0   ;;  %s974_s15 = smov 0  }
   0x6   :  { %s976_s16 = smov 0   ;;  %s978_s17 = smov 0  }
   0x7 LB: > { %s632_s18 = sadd.s32 4294967295, %s933_s17   ;;  %s633_s19 = sadd.s32 4294967294, %s933_s17   ;;  %s933_s17 = sphi %s978_s17, %s20_s17   ;;  %s929_s16 = sphi %s976_s16, %s1359_s16   ;;  %s925_s15 = sphi %s974_s15, %s1358_s15   ;;  %s921_s14 = sphi %s972_s14, %s1357_s14   ;;  %s917_s13 = sphi %s970_s13, %s1356_s13   ;;  %s913_s12 = sphi %s968_s12, %s1355_s12  }
   0x8   : > { %p54_p0 = scmp.ne.s32.totalorder %s917_s13, %s913_s12  ;;  %p1002_p1 = scmp.eq.s32.totalorder %s632_s18, 0 }
   0x9   : > { %p1006_p2 = scmp.eq.s32.totalorder %s632_s18, 1  ;;  %p138_p3 = scmp.eq.s32.totalorder %s633_s19, 1 }
   0xa   : > { %s1342_s20 = scalar_select %p1002_p1, 1, 0 }
   0xb   : > { %p1012_p4 = por %p1002_p1, %p54_p0  ;;  %p634_p5 = scmp.ge.s32.totalorder %s933_s17, 1 }
   0xc   : > { %p1017_p6 = por %p138_p3, %p54_p0  ;;  %p145_p7 = scmp.lt.s32.totalorder %s933_s17, 3 }
   0xd   : > { %s1344_s22 = scalar_select %p1012_p4, 1, 0 }
   0xe   : > { %s1345_s23 = scalar_select %p1017_p6, 1, 0 }
   0xf   : > { %p1022_p8 = pnand %p634_p5, %p145_p7  ;;  %s935_s25 = smov [#allocation5]  }
  0x10   : > { %s160_s26 = sshll.u32 %s935_s25, 4  ;;  %s936_s28 = smov [#allocation7]   ;;  %s1026_s26 = int_to_ptr.vmem [resolvable:$true] %s160_s26 }
  0x11   : > { %p681_p9 = pneg %p1022_p8  ;;  %s176_s29 = sshll.u32 %s936_s28, 4  ;;  %s1037_s29 = int_to_ptr.vmem [resolvable:$true] %s176_s29 }
  0x12   : > { %s761_s5 = scalar_lea.hbm %s1335_s1, 128 }
  0x13   : > { %p1033_p11 = pnand %p681_p9, %p1002_p1  ;;  %p762_p12 = scmp.ne.s32.totalorder %s1335_s1, %s761_s5 }
  0x14   : > { %p768_p5 = scmp.lt.u32.totalorder %s761_s5, %s1335_s1 }
  0x15   : > { %p763_p13 = pneg %p1033_p11 }
  0x17   : > { %p764_p0 = pnand %p763_p13, %p762_p12 }
  0x19   : > { %p765_p3 = pneg %p764_p0 }
  0x1b   : > { %p770_p7 = pnand %p768_p5, %p765_p3 }
  0x1d   : > { %773 = shalt.err (!%p770_p7)
}
  0x1e   : > { %s774_s10 = scalar_lea.vmem %s1026_s26, 128  ;;  %p782_p1 = scmp.lt.s32.totalorder %s1026_s26, %s1026_s26 }
  0x1f   : > { %p775_p9 = scmp.ne.s32.totalorder %s1026_s26, %s774_s10  ;;  %p783_p12 = scmp.lt.s32.totalorder %s774_s10, %s774_s10 }
  0x21   : > { %p777_p10 = pnand %p775_p9, %p763_p13  ;;  %p784_p0 = por %p783_p12, %p782_p1 }
  0x23   : > { %p778_p6 = pneg %p777_p10 }
  0x25   : > { %p785_p4 = pnand %p784_p0, %p778_p6 }
  0x27   : > { %788 = shalt.err (!%p785_p4)
}
  0x28   : > { %s937_s11 = smov 16   ;;  %s938_s18 = smov 1  }
  0x29   : > { %684 = dma.hbm_to_vmem [thread:$0]  (!%p1033_p11), %s1335_s1, 128, %s1026_s26, [#allocation6], %s937_s11, %s937_s11, %s938_s18  }
  0x2a   : > { %s789_s4 = scalar_lea.hbm %s1336_s2, 128 }
  0x2b   : > { %p790_p1 = scmp.ne.s32.totalorder %s1336_s2, %s789_s4  ;;  %p796_p10 = scmp.lt.u32.totalorder %s789_s4, %s1336_s2 }
  0x2d   : > { %p792_p4 = pnand %p790_p1, %p763_p13 }
  0x2f   : > { %p793_p6 = pneg %p792_p4 }
  0x31   : > { %p798_p3 = pnand %p796_p10, %p793_p6 }
  0x33   : > { %801 = shalt.err (!%p798_p3)
}
  0x34   : > { %s802_s26 = scalar_lea.vmem %s1037_s29, 128  ;;  %p810_p12 = scmp.lt.s32.totalorder %s1037_s29, %s1037_s29 }
  0x35   : > { %p803_p5 = scmp.ne.s32.totalorder %s1037_s29, %s802_s26  ;;  %p811_p0 = scmp.lt.s32.totalorder %s802_s26, %s802_s26 }
  0x37   : > { %p805_p7 = pnand %p803_p5, %p763_p13  ;;  %p812_p1 = por %p811_p0, %p810_p12 }
  0x39   : > { %p806_p9 = pneg %p805_p7 }
  0x3b   : > { %p813_p4 = pnand %p812_p1, %p806_p9 }
  0x3d   : > { %816 = shalt.err (!%p813_p4)
}
  0x3e   : > { %687 = dma.hbm_to_vmem [thread:$0]  (!%p1033_p11), %s1336_s2, 128, %s1037_s29, [#allocation6], %s937_s11, %s937_s11, %s938_s18  }
  0x3f   : > { %s32_s19 = sadd.s32 1, %s929_s16  ;;  %s41_s25 = sadd.s32 1, %s921_s14 }
  0x40   : > { %p34_p13 = scmp.ge.s32.totalorder %s32_s19, 2  ;;  %p48_p6 = scmp.ne.s32.totalorder %s921_s14, %s917_s13 }
  0x41   : > { %p49_p10 = scmp.eq.s32.totalorder %s933_s17, 0  ;;  %p698_p3 = scmp.lt.s32.totalorder %s933_s17, 2 }
  0x42   : > { %s1361_s19 = smov (%p34_p13, %s32_s19), 0  ;;  %p1101_p7 = por %p1006_p2, %p48_p6 }
  0x43   : > { %p50_p5 = por %p49_p10, %p48_p6  ;;  %s36_s28 = ssub.s32 %s929_s16, %s1361_s19 }
  0x44   : > { %s1348_s27 = scalar_select %p1101_p7, 1, 0 }
  0x45   : > { %s190_s30 = sand.u32 1, %s921_s14   ;;  %p39_p9 = scmp.eq.s32.totalorder %s36_s28, 0 }
  0x46   : > { %s638_s29 = sshll.u32 %s190_s30, 5  ;;  %s667_s11 = sshll.u32 %s929_s16, 9 }
  0x47   : > { %s1110_s18 = scalar_select %p39_p9, %s921_s14, %s41_s25  }
  0x48   : > { %s1115_s6 = scalar_lea.hbm %s1334_s0, %s667_s11  ;;  %s194_s21 = scalar_lea.vmem [#allocation2], %s638_s29 }
  0x49   : > { %s203_s7 = sshll.u32 %s194_s21, 4  ;;  %p1119_p2 = pnand %p698_p3, %p50_p5  ;;  %s1123_s7 = int_to_ptr.vmem [resolvable:$true] %s203_s7 }
  0x4a   : > { %s1125_s26 = scalar_lea.sflag [#allocation3], %s190_s30  ;;  %s817_s9 = scalar_lea.hbm %s1115_s6, 512 }
  0x4b   : > { %p818_p11 = scmp.ne.s32.totalorder %s1115_s6, %s817_s9  ;;  %p819_p12 = pneg %p1119_p2 }
  0x4c   : > { %s822_s28 = scalar_lea.hbm %s1334_s0, 1024  ;;  %p823_p4 = scmp.lt.u32.totalorder %s1115_s6, %s1334_s0 }
  0x4d   : > { %p820_p0 = pnand %p819_p12, %p818_p11  ;;  %p824_p13 = scmp.lt.u32.totalorder %s822_s28, %s817_s9 }
  0x4e   : > { %p826_p10 = scmp.lt.u32.totalorder %s817_s9, %s1115_s6 }
  0x4f   : > { %p821_p1 = pneg %p820_p0  ;;  %p825_p6 = por %p824_p13, %p823_p4 }
  0x51   : > { %p827_p3 = por %p826_p10, %p825_p6 }
  0x53   : > { %p828_p5 = pnand %p827_p3, %p821_p1 }
  0x55   : > { %831 = shalt.err (!%p828_p5)
}
  0x56   : > { %s832_s30 = scalar_lea.vmem %s1123_s7, 512  ;;  %s939_s4 = smov [#allocation2]  }
  0x57   : > { %p833_p9 = scmp.ne.s32.totalorder %s1123_s7, %s832_s30  ;;  %s837_s5 = sshll.u32 %s939_s4, 4  ;;  %s838_s5 = int_to_ptr.vmem [resolvable:$false] %s837_s5 }
  0x58   : > { %s839_s21 = scalar_lea.vmem %s838_s5, 1024  ;;  %p840_p7 = scmp.lt.s32.totalorder %s1123_s7, %s838_s5 }
  0x59   : > { %p835_p11 = pnand %p833_p9, %p819_p12  ;;  %p841_p4 = scmp.lt.s32.totalorder %s839_s21, %s832_s30 }
  0x5b   : > { %p836_p0 = pneg %p835_p11  ;;  %p842_p13 = por %p841_p4, %p840_p7 }
  0x5d   : > { %p843_p6 = pnand %p842_p13, %p836_p0 }
  0x5f   : > { %846 = shalt.err (!%p843_p6)
}
  0x60   : > { %s940_s9 = smov 64   ;;  %s941_s10 = smov 4  }
  0x61   : > { %691 = dma.hbm_to_vmem [thread:$0]  (!%p1119_p2), %s1115_s6, 512, %s1123_s7, %s1125_s26, %s940_s9, %s940_s9, %s941_s10  }
  0x62   : > { %215 = sbr.rel (%p1022_p8) target bundleno = 496 (0x1f0), region = 32  ;;  %s1156_s25 = sand.u32 (!%p1022_p8), 1, %s917_s13  }
  0x63   : > { %s642_s28 = sshll.u32 (!%p1022_p8), %s1156_s25, 5  ;;  %s218_s29 = scalar_lea.sflag (!%p1022_p8), [#allocation3], %s1156_s25 }
  0x64   : > { %s221_s11 = scalar_lea.vmem (!%p1022_p8), [#allocation2], %s642_s28  ;;  %p1350_p7 = scmp.ne.s32.totalorder (!%p1022_p8), %s1344_s22, 0 }
  0x69   : > { %900 = dma.done.wait (%p1350_p7), %s218_s29, 512  }
  0x6a   : > { %902 = vsyncadd (%p1350_p7), %s218_s29, 4294966784  ;;  %p1351_p2 = scmp.ne.s32.totalorder %s1342_s20, 0 }
  0x6c   : > { %904 = dma.done.wait (%p1351_p2), [#allocation6], 256  }
  0x6d   : > { %906 = vsyncadd (%p1351_p2), [#allocation6], 4294967040  ;;  %v1170_v0 = vld [vmem:[%s221_s11] sm:$0xf]  ;;  %v1172_v1 = vld [vmem:[%s221_s11 + $0x8] sm:$0xf] }
  0x6e   : > { %s942_s24 = smov 32   ;;  %v1178_v2 = vld [vmem:[%s221_s11 + $0x4] sm:$0xf]  ;;  %v1180_v3 = vld [vmem:[%s221_s11 + $0xc] sm:$0xf]  ;;  %s943_s20 = smov 16  }
  0x6f   : > { %265 = vrot.lane.b32.xlu0 %v1170_v0, %s942_s24  ;;  %271 = vrot.lane.b32.xlu1 %v1172_v1, %s942_s24  ;;  %v1186_v4 = vld [vmem:[%s221_s11 + $0x10] sm:$0xf]  ;;  %v1188_v5 = vld [vmem:[%s221_s11 + $0x14] sm:$0xf]  ;;  %v654_v8 = vld [vmem:[#allocation7] ss:$0 sm:$0xff] }
  0x70   : > { %v1194_v6 = vld [vmem:[%s221_s11 + $0x18] sm:$0xf]  ;;  %v1196_v7 = vld [vmem:[%s221_s11 + $0x1c] sm:$0xf]  ;;  %v655_v9 = vld [vmem:[#allocation7 + $0x1] ss:$0 sm:$0xff] }
  0x71   : > { %v656_v10 = vld [vmem:[#allocation7 + $0x2] ss:$0 sm:$0xff]  ;;  %v657_v11 = vld [vmem:[#allocation7 + $0x3] ss:$0 sm:$0xff]  ;;  %v658_v12 = vld [vmem:[#allocation7 + $0x4] ss:$0 sm:$0xff] }
  0x72   : > { %v659_v13 = vld [vmem:[#allocation7 + $0x5] ss:$0 sm:$0xff]  ;;  %vm264_vm0 = vcmask 1047808   ;;  %v660_v30 = vld [vmem:[#allocation7 + $0x6] ss:$0 sm:$0xff]  ;;  %s944_s22 = smov 112  }
  0x73   : > { %268 = vrot.lane.b32.xlu0 %v1178_v2, %s942_s24  ;;  %274 = vrot.lane.b32.xlu1 %v1180_v3, %s942_s24  ;;  %v661_v31 = vld [vmem:[#allocation7 + $0x7] ss:$0 sm:$0xff]  ;;  %vm497_vm1 = vcmask 257024   ;;  %s1255_s6 = scalar_lea.vmem [#allocation8], %s642_s28  ;;  %s668_s7 = sshll.u32 %s925_s15, 9 }
  0x74   : > { %s522_s8 = sshll.u32 %s1255_s6, 4  ;;  %s1281_s4 = scalar_lea.hbm %s1337_s3, %s668_s7  ;;  %s1283_s8 = int_to_ptr.vmem [resolvable:$true] %s522_s8 }
  0x75   : > { %s507_s5 = scalar_lea.sflag [#allocation4], %s1156_s25  ;;  %s847_s21 = scalar_lea.vmem %s1283_s8, 512 }
  0x76   : > { %p848_p8 = scmp.ne.s32.totalorder %s1283_s8, %s847_s21  ;;  %p1352_p12 = scmp.ne.s32.totalorder %s1348_s27, 0 }
  0x77   : > { %277 = vrot.lane.b32.xlu0 %v1186_v4, %s942_s24  ;;  %280 = vrot.lane.b32.xlu1 %v1188_v5, %s942_s24  ;;  %s945_s15 = smov [#allocation8]  }
  0x78   : > { %p849_p1 = pnand %p848_p8, %p1352_p12  ;;  %s851_s9 = sshll.u32 %s945_s15, 4  ;;  %s852_s9 = int_to_ptr.vmem [resolvable:$false] %s851_s9 }
  0x79   : > { %s853_s10 = scalar_lea.vmem %s852_s9, 1024  ;;  %p854_p3 = scmp.lt.s32.totalorder %s1283_s8, %s852_s9 }
  0x7a   : > { %p850_p10 = pneg %p849_p1  ;;  %p855_p5 = scmp.lt.s32.totalorder %s853_s10, %s847_s21 }
  0x7b   : > { %283 = vrot.lane.b32.xlu0 %v1194_v6, %s942_s24  ;;  %286 = vrot.lane.b32.xlu1 %v1196_v7, %s942_s24 }
  0x7c   : > { %p856_p9 = por %p855_p5, %p854_p3 }
  0x7e   : > { %p857_p11 = pnand %p856_p9, %p850_p10 }
  0x7f   : > { %425 = vrot.lane.b32.xlu0 %v654_v8, %s943_s20  ;;  %427 = vrot.lane.b32.xlu1 %v655_v9, %s943_s20  ;;  %v646_v8 = vld [vmem:[#allocation5] ss:$0 sm:$0xff] }
  0x80   : > { %v369_v9 = vmul.f32 %v646_v8, %v1170_v0 }
  0x83   : > { %429 = vrot.lane.b32.xlu0 %v656_v10, %s943_s20  ;;  %431 = vrot.lane.b32.xlu1 %v657_v11, %s943_s20  ;;  %v647_v10 = vld [vmem:[#allocation5 + $0x1] ss:$0 sm:$0xff]  ;;  %v648_v11 = vld [vmem:[#allocation5 + $0x2] ss:$0 sm:$0xff] }
  0x87   : > { %433 = vrot.lane.b32.xlu0 %v658_v12, %s943_s20  ;;  %435 = vrot.lane.b32.xlu1 %v659_v13, %s943_s20 }
  0xe1   : > { %v266_v14 = vpop.permute.xlu0 %265  ;;  %v272_v15 = vpop.permute.xlu1 %271 }
  0xe2   : > { %v267_v16 = vsel %vm264_vm0, %v266_v14, %v1170_v0  ;;  %v273_v17 = vsel %vm264_vm0, %v272_v15, %v1172_v1  ;;  %v370_v14 = vmul.f32 %v647_v10, %v1178_v2  ;;  %v371_v15 = vmul.f32 %v648_v11, %v1172_v1 }
  0xe3   : > { %289 = vrot.lane.b32.xlu0 %v267_v16, %s942_s24  ;;  %v649_v16 = vld [vmem:[#allocation5 + $0x3] ss:$0 sm:$0xff] }
  0xe5   : > { %v269_v18 = vpop.permute.xlu0 %268  ;;  %v275_v19 = vpop.permute.xlu1 %274 }
  0xe6   : > { %v270_v20 = vsel %vm264_vm0, %v269_v18, %v1178_v2  ;;  %v276_v21 = vsel %vm264_vm0, %v275_v19, %v1180_v3 }
  0xe7   : > { %293 = vrot.lane.b32.xlu0 %v273_v17, %s942_s24  ;;  %291 = vrot.lane.b32.xlu1 %v270_v20, %s942_s24  ;;  %v650_v17 = vld [vmem:[#allocation5 + $0x4] ss:$0 sm:$0xff] }
  0xe9   : > { %v278_v22 = vpop.permute.xlu0 %277  ;;  %v281_v23 = vpop.permute.xlu1 %280 }
  0xea   : > { %v279_v24 = vsel %vm264_vm0, %v278_v22, %v1186_v4  ;;  %v282_v25 = vsel %vm264_vm0, %v281_v23, %v1188_v5 }
  0xeb   : > { %295 = vrot.lane.b32.xlu1 %v276_v21, %s942_s24  ;;  %297 = vrot.lane.b32.xlu0 %v279_v24, %s942_s24  ;;  %v651_v21 = vld [vmem:[#allocation5 + $0x5] ss:$0 sm:$0xff] }
  0xed   : > { %v284_v26 = vpop.permute.xlu0 %283  ;;  %v287_v27 = vpop.permute.xlu1 %286 }
  0xee   : > { %v285_v28 = vsel %vm264_vm0, %v284_v26, %v1194_v6  ;;  %v288_v29 = vsel %vm264_vm0, %v287_v27, %v1196_v7  ;;  %v374_v26 = vmul.f32 %v651_v21, %v1188_v5  ;;  %v652_v27 = vld [vmem:[#allocation5 + $0x6] ss:$0 sm:$0xff] }
  0xef   : > { %299 = vrot.lane.b32.xlu1 %v282_v25, %s942_s24  ;;  %301 = vrot.lane.b32.xlu0 %v285_v28, %s942_s24 }
  0xf1   : > { %v426_v32 = vpop.permute.xlu0 %425  ;;  %v428_v33 = vpop.permute.xlu1 %427 }
  0xf3   : > { %303 = vrot.lane.b32.xlu1 %v288_v29, %s942_s24  ;;  %437 = vrot.lane.b32.xlu0 %v660_v30, %s943_s20  ;;  %v653_v29 = vld [vmem:[#allocation5 + $0x7] ss:$0 sm:$0xff] }
  0xf5   : > { %v430_v34 = vpop.permute.xlu0 %429  ;;  %v432_v35 = vpop.permute.xlu1 %431 }
  0xf7   : > { %439 = vrot.lane.b32.xlu1 %v661_v31, %s943_s20 }
  0xf9   : > { %v434_v36 = vpop.permute.xlu0 %433  ;;  %v436_v37 = vpop.permute.xlu1 %435 }
 0x155   : > { %v290_v38 = vpop.permute.xlu0 %289 }
 0x156   : > { %v305_v39 = vsel %vm264_vm0, %v290_v38, %v1170_v0 }
 0x157   : > { %v449_v40 = vmul.f32 %v426_v32, %v305_v39  ;;  %v376_v32 = vmul.f32 %v653_v29, %v1196_v7 }
 0x159   : > { %v292_v41 = vpop.permute.xlu1 %291  ;;  %465 = vrot.lane.b32.xlu0 %v449_v40, %s944_s22  ;;  %v294_v42 = vpop.permute.xlu0 %293 }
 0x15a   : > { %v306_v43 = vsel %vm264_vm0, %v292_v41, %v1178_v2  ;;  %v307_v44 = vsel %vm264_vm0, %v294_v42, %v1172_v1  ;;  %v372_v2 = vmul.f32 %v649_v16, %v1180_v3  ;;  %v373_v1 = vmul.f32 %v650_v17, %v1186_v4 }
 0x15b   : > { %v450_v45 = vmul.f32 %v428_v33, %v306_v43  ;;  %v451_v46 = vmul.f32 %v430_v34, %v307_v44 }
 0x15d   : > { %467 = vrot.lane.b32.xlu1 %v450_v45, %s944_s22  ;;  %v296_v47 = vpop.permute.xlu1 %295  ;;  %469 = vrot.lane.b32.xlu0 %v451_v46, %s944_s22  ;;  %v298_v48 = vpop.permute.xlu0 %297 }
 0x15e   : > { %v308_v49 = vsel %vm264_vm0, %v296_v47, %v1180_v3  ;;  %v309_v50 = vsel %vm264_vm0, %v298_v48, %v1186_v4  ;;  %v375_v4 = vmul.f32 %v652_v27, %v1194_v6 }
 0x15f   : > { %v452_v51 = vmul.f32 %v432_v35, %v308_v49  ;;  %v453_v52 = vmul.f32 %v434_v36, %v309_v50 }
 0x161   : > { %471 = vrot.lane.b32.xlu1 %v452_v51, %s944_s22  ;;  %v300_v53 = vpop.permute.xlu1 %299  ;;  %473 = vrot.lane.b32.xlu0 %v453_v52, %s944_s22  ;;  %v302_v54 = vpop.permute.xlu0 %301 }
 0x162   : > { %v310_v55 = vsel %vm264_vm0, %v300_v53, %v1188_v5  ;;  %v311_v57 = vsel %vm264_vm0, %v302_v54, %v1194_v6 }
 0x163   : > { %v454_v56 = vmul.f32 %v436_v37, %v310_v55 }
 0x165   : > { %475 = vrot.lane.b32.xlu1 %v454_v56, %s944_s22  ;;  %v304_v58 = vpop.permute.xlu1 %303  ;;  %v438_v59 = vpop.permute.xlu0 %437 }
 0x166   : > { %v455_v60 = vmul.f32 %v438_v59, %v311_v57  ;;  %v312_v61 = vsel %vm264_vm0, %v304_v58, %v1196_v7 }
 0x168   : > { %477 = vrot.lane.b32.xlu0 %v455_v60, %s944_s22 }
 0x169   : > { %v440_v62 = vpop.permute.xlu1 %439 }
 0x16a   : > { %v456_v63 = vmul.f32 %v440_v62, %v312_v61 }
 0x16c   : > { %479 = vrot.lane.b32.xlu1 %v456_v63, %s944_s22 }
 0x1cb   : > { %v466_v12 = vpop.permute.xlu0 %465 }
 0x1cc   : > { %v489_v13 = vadd.f32 %v466_v12, %v369_v9 }
 0x1ce   : > { %498 = vst.msk [vmem:[%s1255_s6] sm:$0xf] %vm497_vm1, %v489_v13 }
 0x1cf   : > { %v468_v0 = vpop.permute.xlu1 %467  ;;  %v470_v18 = vpop.permute.xlu0 %469 }
 0x1d0   : > { %v490_v19 = vadd.f32 %v468_v0, %v370_v14  ;;  %v491_v20 = vadd.f32 %v470_v18, %v371_v15 }
 0x1d2   : > { %499 = vst.msk [vmem:[%s1255_s6 + $0x4] sm:$0xf] %vm497_vm1, %v490_v19  ;;  %500 = vst.msk [vmem:[%s1255_s6 + $0x8] sm:$0xf] %vm497_vm1, %v491_v20 }
 0x1d3   : > { %v472_v22 = vpop.permute.xlu1 %471  ;;  %v474_v23 = vpop.permute.xlu0 %473 }
 0x1d4   : > { %v492_v24 = vadd.f32 %v472_v22, %v372_v2  ;;  %v493_v25 = vadd.f32 %v474_v23, %v373_v1 }
 0x1d6   : > { %501 = vst.msk [vmem:[%s1255_s6 + $0xc] sm:$0xf] %vm497_vm1, %v492_v24  ;;  %502 = vst.msk [vmem:[%s1255_s6 + $0x10] sm:$0xf] %vm497_vm1, %v493_v25 }
 0x1d7   : > { %v476_v3 = vpop.permute.xlu1 %475 }
 0x1d8   : > { %v494_v28 = vadd.f32 %v476_v3, %v374_v26 }
 0x1da   : > { %503 = vst.msk [vmem:[%s1255_s6 + $0x14] sm:$0xf] %vm497_vm1, %v494_v28  ;;  %v478_v30 = vpop.permute.xlu0 %477 }
 0x1db   : > { %v495_v31 = vadd.f32 %v478_v30, %v375_v4 }
 0x1dd   : > { %504 = vst.msk [vmem:[%s1255_s6 + $0x18] sm:$0xf] %vm497_vm1, %v495_v31 }
 0x1de   : > { %v480_v5 = vpop.permute.xlu1 %479 }
 0x1df   : > { %v496_v6 = vadd.f32 %v480_v5, %v376_v32 }
 0x1e1   : > { %505 = vst.msk [vmem:[%s1255_s6 + $0x1c] sm:$0xf] %vm497_vm1, %v496_v6 }
 0x1e2   : > { %860 = shalt.err (!%p857_p11)
}
 0x1e3   : > { %s861_s28 = scalar_lea.hbm %s1281_s4, 512  ;;  %s865_s24 = scalar_lea.hbm %s1337_s3, 1024 }
 0x1e4   : > { %p862_p0 = scmp.ne.s32.totalorder %s1281_s4, %s861_s28  ;;  %p866_p6 = scmp.lt.u32.totalorder %s1281_s4, %s1337_s3 }
 0x1e5   : > { %p867_p7 = scmp.lt.u32.totalorder %s865_s24, %s861_s28  ;;  %p869_p8 = scmp.lt.u32.totalorder %s861_s28, %s1281_s4 }
 0x1e6   : > { %p863_p4 = pnand %p862_p0, %p1352_p12 }
 0x1e7   : > { %p868_p2 = por %p867_p7, %p866_p6 }
 0x1e8   : > { %p864_p13 = pneg %p863_p4 }
 0x1e9   : > { %p870_p1 = por %p869_p8, %p868_p2 }
 0x1eb   : > { %p871_p10 = pnand %p870_p1, %p864_p13 }
 0x1ed   : > { %874 = shalt.err (!%p871_p10)
}
 0x1ee   : > { %s946_s6 = smov 64   ;;  %s947_s7 = smov 4  }
 0x1ef   : > { %679 = dma.vmem_to_hbm [thread:$0]  (%p1352_p12), %s1283_s8, 512, %s1281_s4, %s507_s5, %s946_s6, %s946_s6, %s947_s7  }
 0x1f0 PF: > { %s537_s26 = sand.u32 1, %s913_s12   ;;  %p1353_p3 = scmp.ne.s32.totalorder %s1345_s23, 0 }
 0x1f1   : > { %p1354_p5 = scmp.ge.s32.totalorder %s933_s17, 2  ;;  %s538_s30 = scalar_lea.sflag [#allocation4], %s537_s26 }
 0x1f3   : > { %p693_p9 = pnand %p1354_p5, %p1353_p3 }
 0x1f5   : > { %908 = dma.done.wait (!%p693_p9), %s538_s30, 512  }
 0x1f6   : > { %910 = vsyncadd (!%p693_p9), %s538_s30, 4294966784  ;;  %s20_s17 = sadd.s32 1, %s933_s17   ;;  %s1355_s12 = smov %s917_s13 }
 0x1f7   : > { %p17_p11 = scmp.ge.s32.totalorder %s20_s17, 4   ;;  %s1356_s13 = smov %s921_s14 }
 0x1f8   : > { %s1357_s14 = smov %s1110_s18  ;;  %s1358_s15 = smov %s929_s16 }
 0x1f9   : > { %s1359_s16 = smov %s1361_s19  ;;  %19 = sbr.rel (!%p17_p11) target bundleno = 7 (0x7), region = 87 }
 0x200   :  { %543 = vsyncpa [#allocation3], 1 }
 0x201   :  { %545 = vsyncpa [#allocation3 + $0x1], 1 }
 0x202   :  { %546 = vsyncpa [#allocation6], 1 }
 0x203   :  { %547 = vsyncpa [#allocation4], 1 }
 0x204   :  { %549 = vsyncpa [#allocation4 + $0x1], 1 }

</bundles_post_ra>
